<compile_context>
chip_gen: v6e
topology: v6e:2x2x1
jax: 0.10.0
libtpu: 0.0.40
codegen_flags: <defaults>
</compile_context>

<pallas_src>
import functools

import jax
import jax.numpy as jnp
from jax.experimental import pallas as pl
from jax.experimental.pallas import tpu as pltpu

STATE_DIM = 8
HIDDEN = 128
HIDDEN2 = HIDDEN // 2  # 64
K_PAD = 16             # fc1 contraction depth: 8 features + 1 ones row (bias) zero-padded to 16


def _round_up(n, m):
    return ((n + m - 1) // m) * m


def _value_net_kernel(x_ref, w1_ref, w2_ref, b2_ref, w3_ref, b3_ref, o_ref):
    # x_ref : (K_PAD, TB) bf16   rows 0..7 features, row 8 ones (bias), rows 9..15 zero
    # w1_ref: (HIDDEN, K_PAD) bf16   col 8 holds b1, cols 9..15 zero
    # w2_ref: (HIDDEN2, HIDDEN) bf16
    # b2_ref: (HIDDEN2, 1) f32
    # w3_ref: (1, HIDDEN2) f32
    # b3_ref: (1,) f32 scalar in SMEM
    # o_ref : (1, TB) f32 lane-dense output tile
    x = x_ref[...]
    # fc1 (+ folded bias) + ReLU -> (HIDDEN, TB); bf16 operands, f32 accumulation on the MXU.
    h1 = jnp.dot(w1_ref[...], x, preferred_element_type=jnp.float32)
    h1 = jnp.maximum(h1, 0.0).astype(jnp.bfloat16)
    # fc2 + bias + ReLU -> (HIDDEN2, TB); bias/ReLU kept in f32 (v5e has no bf16 VALU).
    h2 = jnp.dot(w2_ref[...], h1, preferred_element_type=jnp.float32)
    h2 = jnp.maximum(h2 + b2_ref[...], 0.0)
    # fc3 on the MXU (slack there); result is already (1, TB) lane-dense.
    out = jnp.dot(w3_ref[...], h2, preferred_element_type=jnp.float32) + b3_ref[0]
    o_ref[...] = out.astype(o_ref.dtype)


@functools.partial(jax.jit, static_argnames=("block_b",))
def value_network_forward(x, params, block_b=8192):
    """x: (B, STATE_DIM) float32. Returns (B, 1) float32.

    block_b=8192 fits the default scoped VMEM on v5e/v6e/v7x; keep <= 16384 on v7x.
    """
    w1, b1, w2, b2, w3, b3 = params
    B = x.shape[0]

    # Batch tile: large to amortize per-grid-step overhead, capped at ceil(B/2) (128-rounded)
    # so the parallel grid spans >= 2 steps for v7x's two TensorCores when the batch allows.
    tb = max(128, _round_up(block_b, 128))
    tb = min(tb, max(128, _round_up(-(-B // 2), 128)))
    b_pad = _round_up(B, tb)
    num_tiles = b_pad // tb

    # Feature-major x with a ones row (folded fc1 bias), zero-padded to K_PAD rows and a whole
    # number of batch tiles, cast to bf16. Under jit this fuses into a single pass over x.
    xt = jnp.concatenate([x.T, jnp.ones((1, B), x.dtype)], axis=0)            # (9, B)
    xt = jnp.pad(xt, ((0, K_PAD - (STATE_DIM + 1)), (0, b_pad - B)))
    xt = xt.astype(jnp.bfloat16)                                              # (K_PAD, b_pad)

    # Weight prep (tiny, fuses under jit): fold b1 into W1, zero-pad K, bf16 MXU operands.
    w1a = jnp.pad(jnp.concatenate([w1, b1[:, None]], axis=1),
                  ((0, 0), (0, K_PAD - (STATE_DIM + 1)))).astype(jnp.bfloat16)  # (HIDDEN, K_PAD)
    w2b = w2.astype(jnp.bfloat16)                                             # (HIDDEN2, HIDDEN)
    b2c = b2[:, None].astype(jnp.float32)                                     # (HIDDEN2, 1)
    w3r = w3.astype(jnp.float32)                                              # (1, HIDDEN2)
    b3s = b3.astype(jnp.float32)                                              # (1,)

    out = pl.pallas_call(
        _value_net_kernel,
        out_shape=jax.ShapeDtypeStruct((1, b_pad), jnp.float32),
        grid=(num_tiles,),
        in_specs=[
            pl.BlockSpec((K_PAD, tb), lambda i: (0, i)),        # x tile: pipelined per step
            pl.BlockSpec((HIDDEN, K_PAD), lambda i: (0, 0)),    # weights: constant index_map
            pl.BlockSpec((HIDDEN2, HIDDEN), lambda i: (0, 0)),  #   -> VMEM-resident
            pl.BlockSpec((HIDDEN2, 1), lambda i: (0, 0)),
            pl.BlockSpec((1, HIDDEN2), lambda i: (0, 0)),
            pl.BlockSpec(memory_space=pltpu.MemorySpace.SMEM),  # scalar bias b3
        ],
        out_specs=pl.BlockSpec((1, tb), lambda i: (0, i)),
        compiler_params=pltpu.CompilerParams(
            dimension_semantics=("parallel",),   # shard batch tiles across TCs on v7x
            vmem_limit_bytes=32 * 1024 * 1024,   # headroom over v5e's 16 MiB default scoped VMEM
        ),
    )(xt, w1a, w2b, b2c, w3r, b3s)

    return out[0, :B].reshape(B, 1)


def init_params(key):
    """nn.Linear-style init (uniform +-1/sqrt(fan_in)) in PyTorch-native (out, in) layout."""
    ks = jax.random.split(key, 6)

    def linear(kw, kb, fan_in, fan_out):
        bound = 1.0 / (fan_in ** 0.5)
        w = jax.random.uniform(kw, (fan_out, fan_in), jnp.float32, -bound, bound)
        b = jax.random.uniform(kb, (fan_out,), jnp.float32, -bound, bound)
        return w, b

    w1, b1 = linear(ks[0], ks[1], STATE_DIM, HIDDEN)
    w2, b2 = linear(ks[2], ks[3], HIDDEN, HIDDEN2)
    w3, b3 = linear(ks[4], ks[5], HIDDEN2, 1)
    return (w1, b1, w2, b2, w3, b3)


def reference_forward(x, params):
    """Plain-XLA f32 reference matching PyTorch nn.Linear semantics (y = x @ W.T + b)."""
    w1, b1, w2, b2, w3, b3 = params
    h1 = jnp.maximum(x @ w1.T + b1, 0.0)
    h2 = jnp.maximum(h1 @ w2.T + b2, 0.0)
    return h2 @ w3.T + b3


if __name__ == "__main__":
    key = jax.random.PRNGKey(0)
    k_params, k_x1, k_x2 = jax.random.split(key, 3)
    params = init_params(k_params)

    # Small-batch check (single tile, grid of 1).
    x_small = jax.random.normal(k_x1, (2, STATE_DIM), jnp.float32)
    out_small = jax.block_until_ready(value_network_forward(x_small, params))
    ref_small = reference_forward(x_small, params)
    assert out_small.shape == (2, 1), out_small.shape
    # bf16 MXU operands (same rounding TPU default matmul precision applies) -> loosened tol.
    assert jnp.allclose(out_small, ref_small, atol=2e-2, rtol=2e-2), (out_small, ref_small)

    # Multi-tile check: non-multiple of the tile, exercises padding + >=2 parallel grid steps.
    x_big = jax.random.normal(k_x2, (384, STATE_DIM), jnp.float32)
    out_big = jax.block_until_ready(value_network_forward(x_big, params))
    ref_big = reference_forward(x_big, params)
    assert out_big.shape == (384, 1), out_big.shape
    assert jnp.allclose(out_big, ref_big, atol=2e-2, rtol=2e-2), (out_big, ref_big)

    print("KERNEL_OK")
</pallas_src>

<mosaic_0001>
module attributes {stable_mosaic.version = 11 : i64} {
  func.func @_value_net_kernel(%arg0: i32, %arg1: memref<16x128xbf16, #tpu.memory_space<vmem>>, %arg2: memref<128x16xbf16, #tpu.memory_space<vmem>>, %arg3: memref<64x128xbf16, #tpu.memory_space<vmem>>, %arg4: memref<64x1xf32, #tpu.memory_space<vmem>>, %arg5: memref<1x64xf32, #tpu.memory_space<vmem>>, %arg6: memref<1xf32, #tpu.memory_space<smem>>, %arg7: memref<1x128xf32, #tpu.memory_space<vmem>>) attributes {dimension_semantics = [#tpu.dimension_semantics<parallel>], iteration_bounds = array<i64: 1>, scalar_prefetch = 0 : i64, scratch_operands = 0 : i64, tpu.core_type = #tpu.core_type<tc>, window_params = [{transform_indices = @transform_0, window_bounds = array<i64: 16, 128>}, {pipeline_mode = #tpu.pipeline_mode<synchronous>, transform_indices = @transform_1, window_bounds = array<i64: 128, 16>}, {pipeline_mode = #tpu.pipeline_mode<synchronous>, transform_indices = @transform_2, window_bounds = array<i64: 64, 128>}, {pipeline_mode = #tpu.pipeline_mode<synchronous>, transform_indices = @transform_3, window_bounds = array<i64: 64, 1>}, {pipeline_mode = #tpu.pipeline_mode<synchronous>, transform_indices = @transform_4, window_bounds = array<i64: 1, 64>}, {transform_indices = @transform_5, window_bounds = array<i64: 1>}, {transform_indices = @transform_6, window_bounds = array<i64: 1, 128>}]} {
    %c0 = arith.constant 0 : index
    %c0_0 = arith.constant 0 : index
    %0 = vector.load %arg1[%c0, %c0_0] : memref<16x128xbf16, #tpu.memory_space<vmem>>, vector<16x128xbf16>
    %c0_1 = arith.constant 0 : index
    %c0_2 = arith.constant 0 : index
    %1 = vector.load %arg2[%c0_1, %c0_2] : memref<128x16xbf16, #tpu.memory_space<vmem>>, vector<128x16xbf16>
    %cst = arith.constant dense<0.000000e+00> : vector<128x128xf32>
    %2 = tpu.matmul %1, %0, %cst {dimension_numbers = #tpu.dot_dimension_numbers<[1], [0], [0], [1], [0, 0, 1, 1], [], []>} : vector<128x16xbf16>, vector<16x128xbf16>, vector<128x128xf32> -> vector<128x128xf32>
    %cst_3 = arith.constant 0.000000e+00 : f32
    %3 = vector.broadcast %cst_3 : f32 to vector<128x128xf32>
    %4 = arith.maximumf %2, %3 : vector<128x128xf32>
    %5 = arith.truncf %4 : vector<128x128xf32> to vector<128x128xbf16>
    %c0_4 = arith.constant 0 : index
    %c0_5 = arith.constant 0 : index
    %6 = vector.load %arg3[%c0_4, %c0_5] : memref<64x128xbf16, #tpu.memory_space<vmem>>, vector<64x128xbf16>
    %cst_6 = arith.constant dense<0.000000e+00> : vector<64x128xf32>
    %7 = tpu.matmul %6, %5, %cst_6 {dimension_numbers = #tpu.dot_dimension_numbers<[1], [0], [0], [1], [0, 0, 1, 1], [], []>} : vector<64x128xbf16>, vector<128x128xbf16>, vector<64x128xf32> -> vector<64x128xf32>
    %c0_7 = arith.constant 0 : index
    %c0_8 = arith.constant 0 : index
    %8 = vector.load %arg4[%c0_7, %c0_8] : memref<64x1xf32, #tpu.memory_space<vmem>>, vector<64x1xf32>
    %9 = vector.broadcast %8 : vector<64x1xf32> to vector<64x128xf32>
    %10 = arith.addf %7, %9 : vector<64x128xf32>
    %cst_9 = arith.constant 0.000000e+00 : f32
    %11 = vector.broadcast %cst_9 : f32 to vector<64x128xf32>
    %12 = arith.maximumf %10, %11 : vector<64x128xf32>
    %c0_10 = arith.constant 0 : index
    %c0_11 = arith.constant 0 : index
    %13 = vector.load %arg5[%c0_10, %c0_11] : memref<1x64xf32, #tpu.memory_space<vmem>>, vector<1x64xf32>
    %cst_12 = arith.constant dense<0.000000e+00> : vector<1x128xf32>
    %14 = tpu.matmul %13, %12, %cst_12 {dimension_numbers = #tpu.dot_dimension_numbers<[1], [0], [0], [1], [0, 0, 1, 1], [], []>} : vector<1x64xf32>, vector<64x128xf32>, vector<1x128xf32> -> vector<1x128xf32>
    %c0_13 = arith.constant 0 : index
    %15 = memref.load %arg6[%c0_13] : memref<1xf32, #tpu.memory_space<smem>>
    %16 = vector.broadcast %15 : f32 to vector<1x128xf32>
    %17 = arith.addf %14, %16 : vector<1x128xf32>
    %c0_14 = arith.constant 0 : index
    %c0_15 = arith.constant 0 : index
    %18 = vector.load %arg7[%c0_14, %c0_15] : memref<1x128xf32, #tpu.memory_space<vmem>>, vector<1x128xf32>
    tpu.vector_store %arg7[%c0_14, %c0_15], %17 {strides = array<i32>} : memref<1x128xf32, #tpu.memory_space<vmem>>, vector<1x128xf32>,
    return
  }
  func.func @transform_0(%arg0: i32) -> (i32, i32) {
    %c0_i32 = arith.constant 0 : i32
    %c0_i32_0 = arith.constant 0 : i32
    return %c0_i32, %arg0 : i32, i32
  }
  func.func @transform_1(%arg0: i32) -> (i32, i32) {
    %c0_i32 = arith.constant 0 : i32
    %c0_i32_0 = arith.constant 0 : i32
    %c0_i32_1 = arith.constant 0 : i32
    return %c0_i32, %c0_i32_0 : i32, i32
  }
  func.func @transform_2(%arg0: i32) -> (i32, i32) {
    %c0_i32 = arith.constant 0 : i32
    %c0_i32_0 = arith.constant 0 : i32
    %c0_i32_1 = arith.constant 0 : i32
    return %c0_i32, %c0_i32_0 : i32, i32
  }
  func.func @transform_3(%arg0: i32) -> (i32, i32) {
    %c0_i32 = arith.constant 0 : i32
    %c0_i32_0 = arith.constant 0 : i32
    %c0_i32_1 = arith.constant 0 : i32
    return %c0_i32, %c0_i32_0 : i32, i32
  }
  func.func @transform_4(%arg0: i32) -> (i32, i32) {
    %c0_i32 = arith.constant 0 : i32
    %c0_i32_0 = arith.constant 0 : i32
    %c0_i32_1 = arith.constant 0 : i32
    return %c0_i32, %c0_i32_0 : i32, i32
  }
  func.func @transform_5(%arg0: i32) -> i32 {
    %c0_i32 = arith.constant 0 : i32
    %c0_i32_0 = arith.constant 0 : i32
    return %c0_i32 : i32
  }
  func.func @transform_6(%arg0: i32) -> (i32, i32) {
    %c0_i32 = arith.constant 0 : i32
    %c0_i32_0 = arith.constant 0 : i32
    return %c0_i32, %arg0 : i32, i32
  }
}

</mosaic_0001>

<bundles_post_ra>
// kernel: value_network_forward.1
= control target key start
LH: loop header
LB: loop body
LE: loop exit
PB: predicated region body
PF: predicated region fallthrough
CT: control target
= control target key end

     0   :  { %vm89_vm0 = vcmask 130048   ;;  %v601_v10 = vmov 0   ;;  %v602_v62 = vmov 0.0   ;;  %vm603_vm1 = vmmov 0   ;;  %s719_s0 = inlined_call_operand.vmem [shape: bf16[16,128], index: 0, kind: input, shape index: {}]   ;;  %s720_s1 = inlined_call_operand.vmem [shape: bf16[128,16], index: 1, kind: input, shape index: {}]   ;;  %s721_s2 = inlined_call_operand.vmem [shape: bf16[64,128], index: 2, kind: input, shape index: {}]   ;;  %s722_s3 = inlined_call_operand.vmem [shape: f32[64,1], index: 3, kind: input, shape index: {}]   ;;  %s723_s4 = inlined_call_operand.vmem [shape: f32[1,64], index: 4, kind: input, shape index: {}]   ;;  %s724_s5 = inlined_call_operand.<no memory space> [shape: f32[1], index: 5, kind: input, shape index: {}]   ;;  %s725_s6 = inlined_call_operand.vmem [shape: f32[1,128], index: 6, kind: output, shape index: {}]  }
   0x1   :  { %v588_v0 = vld [vmem:[%s719_s0] sm:$0xff]   ;;  %v590_v2 = vld [vmem:[%s720_s1 + $0x8] sm:$0xff]   ;;  %v591_v3 = vld [vmem:[%s720_s1 + $0x10] sm:$0xff]   ;;  %587 = vset.pattern.permute.xlu1 %v601_v10  ;;  %586 = vset.pattern.permute.xlu0 %v601_v10  ;;  %vm391_vm2 = vcmask 523264  }
   0x2   :  { %v589_v1 = vld [vmem:[%s720_s1] sm:$0xff]   ;;  %522 = vmatprep.subr.bf16.mxu0 %v588_v0  ;;  %v592_v4 = vld [vmem:[%s720_s1 + $0x18] sm:$0xff]   ;;  %v594_v6 = vld [vmem:[%s720_s1 + $0x28] sm:$0xff]  }
   0x3   :  { %523 = vmatpush3.bf16.msra.mxu0 %v588_v0  ;;  %524 = vmatprep.mubr.msk.bf16.mxu0 %vm89_vm0, %v589_v1  ;;  %v593_v5 = vld [vmem:[%s720_s1 + $0x20] sm:$0xff]   ;;  %v595_v7 = vld [vmem:[%s720_s1 + $0x30] sm:$0xff]   ;;  %v596_v8 = vld [vmem:[%s720_s1 + $0x38] sm:$0xff]  }
   0x4   :  { %v597_v9 = vld [vmem:[%s721_s2] sm:$0xff]   ;;  %v248_v11 = vld [vmem:[%s722_s3 + $0x28] sm:$0xff]  ;;  %v250_v12 = vld [vmem:[%s722_s3 + $0x38] sm:$0xff]  ;;  %564 = vmatprep.subr.mxu0 %v602_v62 }
   0x5   :  { %556 = vmatprep.mubr.bf16.mxu1 %v597_v9  ;;  %278 = vperm.xlu1 %587, %v248_v11   ;;  %v247_v13 = vld [vmem:[%s722_s3 + $0x20] sm:$0xff]  ;;  %v249_v14 = vld [vmem:[%s722_s3 + $0x30] sm:$0xff]  ;;  %v246_v16 = vld [vmem:[%s722_s3 + $0x18] sm:$0xff] }
   0x6   :  { %525 = vmatmul.mubr.msk.bf16.vlgmr.msra.gmra.mxu0 %vm89_vm0, %v590_v2  ;;  %288 = vperm.xlu0 %586, %v250_v12   ;;  %v245_v15 = vld [vmem:[%s722_s3 + $0x10] sm:$0xff]  ;;  %v243_v17 = vld [vmem:[%s722_s3] sm:$0xff]  ;;  %v244_v18 = vld [vmem:[%s722_s3 + $0x8] sm:$0xff] }
   0x7   :  { %528 = vmatprep.mubr.msk.bf16.mxu0 %vm89_vm0, %v591_v3  ;;  %v598_v59 = vld [vmem:[%s721_s2 + $0x8] sm:$0xff]   ;;  %v599_v60 = vld [vmem:[%s721_s2 + $0x10] sm:$0xff]   ;;  %v600_v61 = vld [vmem:[%s721_s2 + $0x18] sm:$0xff]  }
   0x9   :  { %273 = vperm.xlu1 %587, %v247_v13  }
   0xa   :  { %283 = vperm.xlu0 %586, %v249_v14  }
   0xd   :  { %263 = vperm.xlu1 %587, %v245_v15  }
   0xe   :  { %529 = vmatmul.mubr.msk.bf16.gmra.mxu0 %vm89_vm0, %v592_v4  ;;  %268 = vperm.xlu0 %586, %v246_v16  }
   0xf   :  { %532 = vmatprep.mubr.msk.bf16.mxu0 %vm89_vm0, %v593_v5 }
  0x11   :  { %253 = vperm.xlu1 %587, %v243_v17  }
  0x12   :  { %258 = vperm.xlu0 %586, %v244_v18  }
  0x16   :  { %533 = vmatmul.mubr.msk.bf16.gmra.mxu0 %vm89_vm0, %v594_v6 }
  0x17   :  { %536 = vmatprep.mubr.msk.bf16.mxu0 %vm89_vm0, %v595_v7 }
  0x1e   :  { %537 = vmatmul.mubr.msk.bf16.gmra.mxu0 %vm89_vm0, %v596_v8 }
  0x1f   :  { %580 = vmatprep.mubr.msk.f32.mxu0 %vm603_vm1, %v602_v62 }
  0x80   :  { %v279_v2 = vpop.permute.xlu1 %278 }
  0x81   :  { %v289_v0 = vpop.permute.xlu0 %288 }
  0x84   :  { %v274_v7 = vpop.permute.xlu1 %273 }
  0x85   :  { %v284_v5 = vpop.permute.xlu0 %283 }
  0x88   :  { %v264_v16 = vpop.permute.xlu1 %263 }
  0x89   :  { %v269_v12 = vpop.permute.xlu0 %268 }
  0xc6   :  { %v526_v19 = vpop.f32.mrf.mxu0 }
  0xc7   :  { %v213_v54 = vmax.f32 %v526_v19, 0.0 }
  0xc8   :  { %v148_v20 = vpop.f32.mrf.mxu0 }
  0xc9   :  { %v211_v57 = vmax.f32 %v148_v20, 0.0 }
  0xca   :  { %v527_v21 = vpop.f32.mrf.mxu0 }
  0xcb   :  { %v214_v52 = vmax.f32 %v527_v21, 0.0  ;;  %v259_v21 = vpop.permute.xlu0 %258 }
  0xcc   :  { %v151_v22 = vpop.f32.mrf.mxu0 }
  0xcd   :  { %v228_v55 = vpack.c.bf16 %v214_v52, %v213_v54  ;;  %v212_v56 = vmax.f32 %v151_v22, 0.0 }
  0xce   :  { %v530_v23 = vpop.f32.mrf.mxu0 }
  0xcf   :  { %v217_v48 = vmax.f32 %v530_v23, 0.0  ;;  %v227_v58 = vpack.c.bf16 %v212_v56, %v211_v57 }
  0xd0   :  { %v164_v24 = vpop.f32.mrf.mxu0 }
  0xd1   :  { %v215_v51 = vmax.f32 %v164_v24, 0.0  ;;  %v254_v24 = vpop.permute.xlu1 %253 }
  0xd2   :  { %v531_v25 = vpop.f32.mrf.mxu0 }
  0xd3   :  { %v218_v46 = vmax.f32 %v531_v25, 0.0 }
  0xd4   :  { %v167_v26 = vpop.f32.mrf.mxu0 }
  0xd5   :  { %v230_v49 = vpack.c.bf16 %v218_v46, %v217_v48  ;;  %v216_v50 = vmax.f32 %v167_v26, 0.0 }
  0xd6   :  { %v534_v27 = vpop.f32.mrf.mxu0 }
  0xd7   :  { %v221_v42 = vmax.f32 %v534_v27, 0.0  ;;  %v229_v53 = vpack.c.bf16 %v216_v50, %v215_v51 }
  0xd8   :  { %v180_v28 = vpop.f32.mrf.mxu0 }
  0xd9   :  { %v219_v45 = vmax.f32 %v180_v28, 0.0 }
  0xda   :  { %v535_v29 = vpop.f32.mrf.mxu0 }
  0xdb   :  { %v222_v40 = vmax.f32 %v535_v29, 0.0 }
  0xdc   :  { %v183_v30 = vpop.f32.mrf.mxu0 }
  0xdd   :  { %v232_v43 = vpack.c.bf16 %v222_v40, %v221_v42  ;;  %v220_v44 = vmax.f32 %v183_v30, 0.0 }
  0xde   :  { %v538_v31 = vpop.f32.mrf.mxu0 }
  0xdf   :  { %v225_v34 = vmax.f32 %v538_v31, 0.0  ;;  %v231_v47 = vpack.c.bf16 %v220_v44, %v219_v45  ;;  %v388_v31 = vld [vmem:[%s723_s4] sm:$0x1] }
  0xe0   :  { %v196_v32 = vpop.f32.mrf.mxu0 }
  0xe1   :  { %v223_v37 = vmax.f32 %v196_v32, 0.0  ;;  %v390_v32 = vstv %s724_s5 }
  0xe2   :  { %v539_v33 = vpop.f32.mrf.mxu0 }
  0xe3   :  { %v226_v35 = vmax.f32 %v539_v33, 0.0 }
  0xe4   :  { %v199_v36 = vpop.f32.mrf.mxu0 }
  0xe5   :  { %v224_v38 = vmax.f32 %v199_v36, 0.0  ;;  %v234_v39 = vpack.c.bf16 %v226_v35, %v225_v34 }
  0xe7   :  { %v233_v41 = vpack.c.bf16 %v224_v38, %v223_v37  ;;  %540 = vmatprep.subr.bf16.mxu1 %v234_v39 }
  0xe8   :  { %541 = vmatpush3.bf16.msra.mxu1 %v234_v39 }
  0xe9   :  { %542 = vmatprep.subr.bf16.mxu1 %v233_v41 }
  0xec   :  { %543 = vmatpush3.bf16.msra.mxu1 %v233_v41 }
  0xed   :  { %544 = vmatprep.subr.bf16.mxu1 %v232_v43 }
  0xf0   :  { %545 = vmatpush3.bf16.msra.mxu1 %v232_v43 }
  0xf1   :  { %546 = vmatprep.subr.bf16.mxu1 %v231_v47 }
  0xf4   :  { %547 = vmatpush3.bf16.msra.mxu1 %v231_v47 }
  0xf5   :  { %548 = vmatprep.subr.bf16.mxu1 %v230_v49 }
  0xf8   :  { %549 = vmatpush3.bf16.msra.mxu1 %v230_v49 }
  0xf9   :  { %550 = vmatprep.subr.bf16.mxu1 %v229_v53 }
  0xfc   :  { %551 = vmatpush3.bf16.msra.mxu1 %v229_v53 }
  0xfd   :  { %552 = vmatprep.subr.bf16.mxu1 %v228_v55 }
 0x100   :  { %553 = vmatpush3.bf16.msra.mxu1 %v228_v55 }
 0x101   :  { %554 = vmatprep.subr.bf16.mxu1 %v227_v58 }
 0x104   :  { %555 = vmatpush3.bf16.msra.mxu1 %v227_v58 }
 0x107   :  { %557 = vmatmul.mubr.bf16.vlgmr.msra.gmra.mxu1 %v598_v59 }
 0x108   :  { %560 = vmatprep.mubr.bf16.mxu1 %v599_v60 }
 0x10f   :  { %561 = vmatmul.mubr.bf16.gmra.mxu1 %v600_v61 }
 0x1c7   :  { %v558_v63 = vpop.f32.mrf.mxu1 }
 0x1c8   :  { %v358_v22 = vadd.f32 %v558_v63, %v264_v16 }
 0x1c9   :  { %v349_v1 = vpop.f32.mrf.mxu1 }
 0x1ca   :  { %v382_v27 = vmax.f32 %v358_v22, 0.0  ;;  %v350_v28 = vadd.f32 %v349_v1, %v254_v24 }
 0x1cb   :  { %v559_v3 = vpop.f32.mrf.mxu1 }
 0x1cc   :  { %v361_v19 = vadd.f32 %v559_v3, %v269_v12  ;;  %v380_v30 = vmax.f32 %v350_v28, 0.0 }
 0x1cd   :  { %v352_v4 = vpop.f32.mrf.mxu1 }
 0x1ce   :  { %v383_v25 = vmax.f32 %v361_v19, 0.0  ;;  %v353_v26 = vadd.f32 %v352_v4, %v259_v21 }
 0x1cf   :  { %v562_v6 = vpop.f32.mrf.mxu1 }
 0x1d0   :  { %v374_v10 = vadd.f32 %v562_v6, %v284_v5  ;;  %v381_v29 = vmax.f32 %v353_v26, 0.0 }
 0x1d1   :  { %v365_v8 = vpop.f32.mrf.mxu1 }
 0x1d2   :  { %v386_v17 = vmax.f32 %v374_v10, 0.0  ;;  %v366_v18 = vadd.f32 %v365_v8, %v274_v7 }
 0x1d3   :  { %v563_v9 = vpop.f32.mrf.mxu1 }
 0x1d4   :  { %v377_v11 = vadd.f32 %v563_v9, %v289_v0  ;;  %v384_v23 = vmax.f32 %v366_v18, 0.0 }
 0x1d5   :  { %v368_v13 = vpop.f32.mrf.mxu1 }
 0x1d6   :  { %v387_v14 = vmax.f32 %v377_v11, 0.0  ;;  %v369_v15 = vadd.f32 %v368_v13, %v279_v2 }
 0x1d8   :  { %565 = vmatpush3.msra.mxu0 %v387_v14  ;;  %v385_v20 = vmax.f32 %v369_v15, 0.0 }
 0x1d9   :  { %566 = vmatprep.subr.mxu0 %v602_v62 }
 0x1da   :  { %567 = vmatpush3.msra.mxu0 %v386_v17 }
 0x1db   :  { %568 = vmatprep.subr.mxu0 %v602_v62 }
 0x1dc   :  { %569 = vmatpush3.msra.mxu0 %v385_v20 }
 0x1dd   :  { %570 = vmatprep.subr.mxu0 %v602_v62 }
 0x1de   :  { %571 = vmatpush3.msra.mxu0 %v384_v23 }
 0x1df   :  { %572 = vmatprep.subr.mxu0 %v602_v62 }
 0x1e0   :  { %573 = vmatpush3.msra.mxu0 %v383_v25 }
 0x1e1   :  { %574 = vmatprep.subr.mxu0 %v602_v62 }
 0x1e2   :  { %575 = vmatpush3.msra.mxu0 %v382_v27 }
 0x1e3   :  { %576 = vmatprep.subr.mxu0 %v602_v62 }
 0x1e4   :  { %577 = vmatpush3.msra.mxu0 %v381_v29 }
 0x1e5   :  { %578 = vmatprep.subr.mxu0 %v602_v62 }
 0x1e6   :  { %579 = vmatpush3.msra.mxu0 %v380_v30 }
 0x1e7   :  { %581 = vmatmul.mubr.msk.f32.vlgmr.msra.gmra.mxu0 %vm391_vm2, %v388_v31 }
 0x2a7   :  { %v461_v33 = vpop.f32.mrf.mxu0 }
 0x2a8   :  { %v462_v34 = vadd.f32 %v461_v33, %v390_v32 }
 0x2a9   :  { %v582_v35 = vpop.f32.mrf.mxu0 }
 0x2aa   :  { %465 = vst [vmem:[%s725_s6] sm:$0x1] %v462_v34 }

</bundles_post_ra>
